<compile_context>
chip_gen: v5e
topology: v5e:2x2
jax: 0.10.0
libtpu: 0.0.40
codegen_flags: <defaults>
</compile_context>

<pallas_src>
import functools

import jax
import jax.numpy as jnp
from jax.experimental import pallas as pl
from jax.experimental.pallas import tpu as pltpu

IN_F = 254      # fc1 input features
H_PAD = 128     # lane-padded hidden width (covers both 6 and 100)
FC2_F = 100     # fc2 output features
FC3_F = 2       # fc3 output features


def _sigmoid(x):
    # sigmoid(z) == 0.5 * tanh(z / 2) + 0.5 : a single EUP op per element.
    return 0.5 * jnp.tanh(0.5 * x) + 0.5


def uci_kernel(x_ref, w1_ref, b1_ref, w2_ref, b2_ref, w3_ref, b3_ref,
               fc2_ref, fc3_ref):
    # (TB, 254) f32 from HBM -> bf16 in VMEM (cast is cheap VPU work).
    x = x_ref[...].astype(jnp.bfloat16)

    # fc1 + sigmoid.  w1 is (254, 128) bf16; lanes 6:128 of h1 are padding.
    h1 = _sigmoid(jnp.dot(x, w1_ref[...], preferred_element_type=jnp.float32)
                  + b1_ref[...])
    h1 = h1.astype(jnp.bfloat16)

    # fc2 + sigmoid.  w2 rows 6:128 are zero so h1's padding lanes never leak.
    h2 = _sigmoid(jnp.dot(h1, w2_ref[...], preferred_element_type=jnp.float32)
                  + b2_ref[...])                   # (TB, 128) f32, lanes 0:100 live

    # First output: sigmoid(fc2), stored directly at its final 100-lane width.
    fc2_ref[...] = h2[:, :FC2_F].astype(fc2_ref.dtype)

    # fc3 (no activation).  w3 rows 100:128 are zero so h2's padding never leaks.
    h2b = h2.astype(jnp.bfloat16)
    o3 = jnp.dot(h2b, w3_ref[...], preferred_element_type=jnp.float32) + b3_ref[...]
    fc3_ref[...] = o3[:, :FC3_F].astype(fc3_ref.dtype)


def _round_up(n, m):
    return ((n + m - 1) // m) * m


def _pick_tb(batch, tb_max):
    """Batch tile: multiple of 8, >= 2 tiles when possible (v7x megacore)."""
    if batch <= 8:
        return batch                       # full-extent block: legal for any batch
    tb = _round_up(pl.cdiv(batch, 2), 8)
    return max(8, min(tb_max, tb))


def _prep_params(params):
    """Pack torch-convention (out, in) weights into padded, lane-dense mats."""
    w1, b1 = params["w1"], params["b1"]    # (6, 254), (6,)
    w2, b2 = params["w2"], params["b2"]    # (100, 6), (100,)
    w3, b3 = params["w3"], params["b3"]    # (2, 100), (2,)

    w1p = (jnp.zeros((IN_F, H_PAD), jnp.float32)
           .at[:, :6].set(w1.T).astype(jnp.bfloat16))
    b1p = jnp.zeros((1, H_PAD), jnp.float32).at[0, :6].set(b1)

    w2p = (jnp.zeros((H_PAD, H_PAD), jnp.float32)
           .at[:6, :FC2_F].set(w2.T).astype(jnp.bfloat16))
    b2p = jnp.zeros((1, H_PAD), jnp.float32).at[0, :FC2_F].set(b2)

    w3p = (jnp.zeros((H_PAD, H_PAD), jnp.float32)
           .at[:FC2_F, :FC3_F].set(w3.T).astype(jnp.bfloat16))
    b3p = jnp.zeros((1, H_PAD), jnp.float32).at[0, :FC3_F].set(b3)

    return w1p, b1p, w2p, b2p, w3p, b3p


@functools.partial(jax.jit, static_argnames=("tb_max",))
def uci_forward(x, params, *, tb_max=4096):
    """x: (B, 254) float32.  Returns (sigmoid(fc2) (B,100) bf16, fc3 (B,2) f32)."""
    B = x.shape[0]
    TB = _pick_tb(B, tb_max)
    n_tiles = pl.cdiv(B, TB)

    w1p, b1p, w2p, b2p, w3p, b3p = _prep_params(params)

    flops = 2 * B * (IN_F * H_PAD + 2 * H_PAD * H_PAD)
    bytes_accessed = (B * IN_F * 4 + B * FC2_F * 2 + B * FC3_F * 4
                      + (IN_F * H_PAD + 2 * H_PAD * H_PAD) * 2 + 3 * H_PAD * 4)

    fc2, fc3 = pl.pallas_call(
        uci_kernel,
        out_shape=(jax.ShapeDtypeStruct((B, FC2_F), jnp.bfloat16),
                   jax.ShapeDtypeStruct((B, FC3_F), jnp.float32)),
        grid=(n_tiles,),
        in_specs=[
            pl.BlockSpec((TB, IN_F), lambda i: (i, 0)),       # x tile (streams)
            pl.BlockSpec((IN_F, H_PAD), lambda i: (0, 0)),    # w1 (resident)
            pl.BlockSpec((1, H_PAD), lambda i: (0, 0)),       # b1
            pl.BlockSpec((H_PAD, H_PAD), lambda i: (0, 0)),   # w2
            pl.BlockSpec((1, H_PAD), lambda i: (0, 0)),       # b2
            pl.BlockSpec((H_PAD, H_PAD), lambda i: (0, 0)),   # w3
            pl.BlockSpec((1, H_PAD), lambda i: (0, 0)),       # b3
        ],
        out_specs=(pl.BlockSpec((TB, FC2_F), lambda i: (i, 0)),
                   pl.BlockSpec((TB, FC3_F), lambda i: (i, 0))),
        compiler_params=pltpu.CompilerParams(
            dimension_semantics=("parallel",),       # megacore shards batch tiles
            vmem_limit_bytes=48 * 1024 * 1024,       # safe on v5e/v6e/v7x
        ),
        cost_estimate=pl.CostEstimate(
            flops=flops,
            transcendentals=2 * B * H_PAD,
            bytes_accessed=bytes_accessed),
    )(x, w1p, b1p, w2p, b2p, w3p, b3p)
    return fc2, fc3


def init_params(key):
    """Deterministic synthetic params matching nn.Linear shapes (out, in)."""
    ks = jax.random.split(key, 6)

    def lin(kw, kb, out_f, in_f):
        bound = 1.0 / jnp.sqrt(in_f)
        w = jax.random.uniform(kw, (out_f, in_f), jnp.float32, -bound, bound)
        b = jax.random.uniform(kb, (out_f,), jnp.float32, -bound, bound)
        return w, b

    w1, b1 = lin(ks[0], ks[1], 6, 254)
    w2, b2 = lin(ks[2], ks[3], 100, 6)
    w3, b3 = lin(ks[4], ks[5], 2, 100)
    return {"w1": w1, "b1": b1, "w2": w2, "b2": b2, "w3": w3, "b3": b3}


if __name__ == "__main__":
    key = jax.random.PRNGKey(0)
    kx, kp = jax.random.split(key)
    B = 8
    x = jax.random.normal(kx, (B, 254), jnp.float32)
    params = init_params(kp)

    out_fc2, out_fc3 = uci_forward(x, params)
    jax.block_until_ready((out_fc2, out_fc3))

    # Pure-JAX f32 reference (kernel streams x/w/h in bf16 -> loosened tolerance).
    h1 = jax.nn.sigmoid(x @ params["w1"].T + params["b1"])
    h2_ref = jax.nn.sigmoid(h1 @ params["w2"].T + params["b2"])
    o3_ref = h2_ref @ params["w3"].T + params["b3"]

    assert out_fc2.shape == (B, 100) and out_fc3.shape == (B, 2)
    assert jnp.allclose(out_fc2.astype(jnp.float32), h2_ref, atol=2e-2), float(
        jnp.max(jnp.abs(out_fc2.astype(jnp.float32) - h2_ref)))
    assert jnp.allclose(out_fc3, o3_ref, atol=3e-2), float(
        jnp.max(jnp.abs(out_fc3 - o3_ref)))

    print("KERNEL_OK")
</pallas_src>

<mosaic_0001>
module attributes {stable_mosaic.version = 11 : i64} {
  func.func @uci_kernel(%arg0: i32, %arg1: memref<8x254xf32, #tpu.memory_space<vmem>>, %arg2: memref<254x128xbf16, #tpu.memory_space<vmem>>, %arg3: memref<1x128xf32, #tpu.memory_space<vmem>>, %arg4: memref<128x128xbf16, #tpu.memory_space<vmem>>, %arg5: memref<1x128xf32, #tpu.memory_space<vmem>>, %arg6: memref<128x128xbf16, #tpu.memory_space<vmem>>, %arg7: memref<1x128xf32, #tpu.memory_space<vmem>>, %arg8: memref<8x100xbf16, #tpu.memory_space<vmem>>, %arg9: memref<8x2xf32, #tpu.memory_space<vmem>>) attributes {dimension_semantics = [#tpu.dimension_semantics<parallel>], iteration_bounds = array<i64: 1>, scalar_prefetch = 0 : i64, scratch_operands = 0 : i64, tpu.core_type = #tpu.core_type<tc>, window_params = [{transform_indices = @transform_0, window_bounds = array<i64: 8, 254>}, {pipeline_mode = #tpu.pipeline_mode<synchronous>, transform_indices = @transform_1, window_bounds = array<i64: 254, 128>}, {pipeline_mode = #tpu.pipeline_mode<synchronous>, transform_indices = @transform_2, window_bounds = array<i64: 1, 128>}, {pipeline_mode = #tpu.pipeline_mode<synchronous>, transform_indices = @transform_3, window_bounds = array<i64: 128, 128>}, {pipeline_mode = #tpu.pipeline_mode<synchronous>, transform_indices = @transform_4, window_bounds = array<i64: 1, 128>}, {pipeline_mode = #tpu.pipeline_mode<synchronous>, transform_indices = @transform_5, window_bounds = array<i64: 128, 128>}, {pipeline_mode = #tpu.pipeline_mode<synchronous>, transform_indices = @transform_6, window_bounds = array<i64: 1, 128>}, {transform_indices = @transform_7, window_bounds = array<i64: 8, 100>}, {transform_indices = @transform_8, window_bounds = array<i64: 8, 2>}]} {
    %c0 = arith.constant 0 : index
    %c0_0 = arith.constant 0 : index
    %0 = vector.load %arg1[%c0, %c0_0] : memref<8x254xf32, #tpu.memory_space<vmem>>, vector<8x254xf32>
    %1 = arith.truncf %0 : vector<8x254xf32> to vector<8x254xbf16>
    %c0_1 = arith.constant 0 : index
    %c0_2 = arith.constant 0 : index
    %2 = vector.load %arg2[%c0_1, %c0_2] : memref<254x128xbf16, #tpu.memory_space<vmem>>, vector<254x128xbf16>
    %cst = arith.constant dense<0.000000e+00> : vector<8x128xf32>
    %3 = tpu.matmul %1, %2, %cst {dimension_numbers = #tpu.dot_dimension_numbers<[1], [0], [0], [1], [0, 0, 1, 1], [], []>} : vector<8x254xbf16>, vector<254x128xbf16>, vector<8x128xf32> -> vector<8x128xf32>
    %c0_3 = arith.constant 0 : index
    %c0_4 = arith.constant 0 : index
    %4 = vector.load %arg3[%c0_3, %c0_4] : memref<1x128xf32, #tpu.memory_space<vmem>>, vector<1x128xf32>
    %5 = vector.broadcast %4 : vector<1x128xf32> to vector<8x128xf32>
    %6 = arith.addf %3, %5 : vector<8x128xf32>
    %cst_5 = arith.constant 5.000000e-01 : f32
    %7 = vector.broadcast %cst_5 : f32 to vector<8x128xf32>
    %8 = arith.mulf %7, %6 : vector<8x128xf32>
    %9 = math.tanh %8 : vector<8x128xf32>
    %cst_6 = arith.constant 5.000000e-01 : f32
    %10 = vector.broadcast %cst_6 : f32 to vector<8x128xf32>
    %11 = arith.mulf %10, %9 : vector<8x128xf32>
    %cst_7 = arith.constant 5.000000e-01 : f32
    %12 = vector.broadcast %cst_7 : f32 to vector<8x128xf32>
    %13 = arith.addf %11, %12 : vector<8x128xf32>
    %14 = arith.truncf %13 : vector<8x128xf32> to vector<8x128xbf16>
    %c0_8 = arith.constant 0 : index
    %c0_9 = arith.constant 0 : index
    %15 = vector.load %arg4[%c0_8, %c0_9] : memref<128x128xbf16, #tpu.memory_space<vmem>>, vector<128x128xbf16>
    %cst_10 = arith.constant dense<0.000000e+00> : vector<8x128xf32>
    %16 = tpu.matmul %14, %15, %cst_10 {dimension_numbers = #tpu.dot_dimension_numbers<[1], [0], [0], [1], [0, 0, 1, 1], [], []>} : vector<8x128xbf16>, vector<128x128xbf16>, vector<8x128xf32> -> vector<8x128xf32>
    %c0_11 = arith.constant 0 : index
    %c0_12 = arith.constant 0 : index
    %17 = vector.load %arg5[%c0_11, %c0_12] : memref<1x128xf32, #tpu.memory_space<vmem>>, vector<1x128xf32>
    %18 = vector.broadcast %17 : vector<1x128xf32> to vector<8x128xf32>
    %19 = arith.addf %16, %18 : vector<8x128xf32>
    %cst_13 = arith.constant 5.000000e-01 : f32
    %20 = vector.broadcast %cst_13 : f32 to vector<8x128xf32>
    %21 = arith.mulf %20, %19 : vector<8x128xf32>
    %22 = math.tanh %21 : vector<8x128xf32>
    %cst_14 = arith.constant 5.000000e-01 : f32
    %23 = vector.broadcast %cst_14 : f32 to vector<8x128xf32>
    %24 = arith.mulf %23, %22 : vector<8x128xf32>
    %cst_15 = arith.constant 5.000000e-01 : f32
    %25 = vector.broadcast %cst_15 : f32 to vector<8x128xf32>
    %26 = arith.addf %24, %25 : vector<8x128xf32>
    %27 = vector.extract_strided_slice %26 {offsets = [0, 0], sizes = [8, 100], strides = [1, 1]} : vector<8x128xf32> to vector<8x100xf32>
    %28 = arith.truncf %27 : vector<8x100xf32> to vector<8x100xbf16>
    %c0_16 = arith.constant 0 : index
    %c0_17 = arith.constant 0 : index
    %29 = vector.load %arg8[%c0_16, %c0_17] : memref<8x100xbf16, #tpu.memory_space<vmem>>, vector<8x100xbf16>
    tpu.vector_store %arg8[%c0_16, %c0_17], %28 {strides = array<i32>} : memref<8x100xbf16, #tpu.memory_space<vmem>>, vector<8x100xbf16>,
    %30 = arith.truncf %26 : vector<8x128xf32> to vector<8x128xbf16>
    %c0_18 = arith.constant 0 : index
    %c0_19 = arith.constant 0 : index
    %31 = vector.load %arg6[%c0_18, %c0_19] : memref<128x128xbf16, #tpu.memory_space<vmem>>, vector<128x128xbf16>
    %cst_20 = arith.constant dense<0.000000e+00> : vector<8x128xf32>
    %32 = tpu.matmul %30, %31, %cst_20 {dimension_numbers = #tpu.dot_dimension_numbers<[1], [0], [0], [1], [0, 0, 1, 1], [], []>} : vector<8x128xbf16>, vector<128x128xbf16>, vector<8x128xf32> -> vector<8x128xf32>
    %c0_21 = arith.constant 0 : index
    %c0_22 = arith.constant 0 : index
    %33 = vector.load %arg7[%c0_21, %c0_22] : memref<1x128xf32, #tpu.memory_space<vmem>>, vector<1x128xf32>
    %34 = vector.broadcast %33 : vector<1x128xf32> to vector<8x128xf32>
    %35 = arith.addf %32, %34 : vector<8x128xf32>
    %36 = vector.extract_strided_slice %35 {offsets = [0, 0], sizes = [8, 2], strides = [1, 1]} : vector<8x128xf32> to vector<8x2xf32>
    %c0_23 = arith.constant 0 : index
    %c0_24 = arith.constant 0 : index
    %37 = vector.load %arg9[%c0_23, %c0_24] : memref<8x2xf32, #tpu.memory_space<vmem>>, vector<8x2xf32>
    tpu.vector_store %arg9[%c0_23, %c0_24], %36 {strides = array<i32>} : memref<8x2xf32, #tpu.memory_space<vmem>>, vector<8x2xf32>,
    return
  }
  func.func @transform_0(%arg0: i32) -> (i32, i32) {
    %c0_i32 = arith.constant 0 : i32
    %c0_i32_0 = arith.constant 0 : i32
    return %arg0, %c0_i32 : i32, i32
  }
  func.func @transform_1(%arg0: i32) -> (i32, i32) {
    %c0_i32 = arith.constant 0 : i32
    %c0_i32_0 = arith.constant 0 : i32
    %c0_i32_1 = arith.constant 0 : i32
    return %c0_i32, %c0_i32_0 : i32, i32
  }
  func.func @transform_2(%arg0: i32) -> (i32, i32) {
    %c0_i32 = arith.constant 0 : i32
    %c0_i32_0 = arith.constant 0 : i32
    %c0_i32_1 = arith.constant 0 : i32
    return %c0_i32, %c0_i32_0 : i32, i32
  }
  func.func @transform_3(%arg0: i32) -> (i32, i32) {
    %c0_i32 = arith.constant 0 : i32
    %c0_i32_0 = arith.constant 0 : i32
    %c0_i32_1 = arith.constant 0 : i32
    return %c0_i32, %c0_i32_0 : i32, i32
  }
  func.func @transform_4(%arg0: i32) -> (i32, i32) {
    %c0_i32 = arith.constant 0 : i32
    %c0_i32_0 = arith.constant 0 : i32
    %c0_i32_1 = arith.constant 0 : i32
    return %c0_i32, %c0_i32_0 : i32, i32
  }
  func.func @transform_5(%arg0: i32) -> (i32, i32) {
    %c0_i32 = arith.constant 0 : i32
    %c0_i32_0 = arith.constant 0 : i32
    %c0_i32_1 = arith.constant 0 : i32
    return %c0_i32, %c0_i32_0 : i32, i32
  }
  func.func @transform_6(%arg0: i32) -> (i32, i32) {
    %c0_i32 = arith.constant 0 : i32
    %c0_i32_0 = arith.constant 0 : i32
    %c0_i32_1 = arith.constant 0 : i32
    return %c0_i32, %c0_i32_0 : i32, i32
  }
  func.func @transform_7(%arg0: i32) -> (i32, i32) {
    %c0_i32 = arith.constant 0 : i32
    %c0_i32_0 = arith.constant 0 : i32
    return %arg0, %c0_i32 : i32, i32
  }
  func.func @transform_8(%arg0: i32) -> (i32, i32) {
    %c0_i32 = arith.constant 0 : i32
    %c0_i32_0 = arith.constant 0 : i32
    return %arg0, %c0_i32 : i32, i32
  }
}

</mosaic_0001>

<bundles_post_ra>
// kernel: uci_forward.1
= control target key start
LH: loop header
LB: loop body
LE: loop exit
PB: predicated region body
PF: predicated region fallthrough
CT: control target
= control target key end

     0   :  { %vm168_vm0 = vcmask 1046528   ;;  %s755_s0 = inlined_call_operand.vmem [shape: f32[8,254], index: 0, kind: input, shape index: {}]   ;;  %s756_s1 = inlined_call_operand.vmem [shape: bf16[254,128], index: 1, kind: input, shape index: {}]   ;;  %s757_s2 = inlined_call_operand.vmem [shape: f32[1,128], index: 2, kind: input, shape index: {}]   ;;  %s758_s3 = inlined_call_operand.vmem [shape: bf16[128,128], index: 3, kind: input, shape index: {}]   ;;  %s759_s4 = inlined_call_operand.vmem [shape: f32[1,128], index: 4, kind: input, shape index: {}]   ;;  %s760_s5 = inlined_call_operand.vmem [shape: bf16[128,128], index: 5, kind: input, shape index: {}]   ;;  %s761_s6 = inlined_call_operand.vmem [shape: f32[1,128], index: 6, kind: input, shape index: {}]   ;;  %s762_s7 = inlined_call_operand.hbm [shape: bf16[8,100], index: 7, kind: output, shape index: {0}]   ;;  %s763_s8 = inlined_call_operand.vmem [shape: f32[8,2], index: 8, kind: output, shape index: {1}]  }
   0x1   :  { %v530_v0 = vld [vmem:[%s756_s1 + $0x38] sm:$0xff]  ;;  %v529_v4 = vld [vmem:[%s756_s1 + $0x30] sm:$0xff]  ;;  %v528_v7 = vld [vmem:[%s756_s1 + $0x28] sm:$0xff] }
   0x2   :  { %v456_v1 = vld [vmem:[%s756_s1 + $0x78] sm:$0xf]  ;;  %v538_v2 = vld [vmem:[%s756_s1 + $0x78] sm:$0x70]  ;;  %172 = vmatpush.bf16.msra.mxu0 %v530_v0  ;;  %v537_v6 = vld [vmem:[%s756_s1 + $0x70] sm:$0xff] }
   0x3   :  { %v457_v3 = vor.u32 %v538_v2, %v456_v1  ;;  %v546_v8 = vld [vmem:[%s758_s3 + $0x38] sm:$0xff]  ;;  %v536_v9 = vld [vmem:[%s756_s1 + $0x68] sm:$0xff]  ;;  %v545_v10 = vld [vmem:[%s758_s3 + $0x30] sm:$0xff] }
   0x4   :  { %271 = vmatpush.bf16.msra.mxu2 %v546_v8 }
   0x5   :  { %v170_v5 = vsel %vm168_vm0, %v457_v3, 0 }
   0x6   :  { %185 = vmatpush.bf16.msra.mxu1 %v170_v5  ;;  %173 = vmatpush.bf16.msra.mxu0 %v529_v4 }
   0xa   :  { %186 = vmatpush.bf16.msra.mxu1 %v537_v6 }
   0xb   :  { %14 = vsyncpa [#allocation3], 0  ;;  %174 = vmatpush.bf16.msra.mxu0 %v528_v7  ;;  %v527_v11 = vld [vmem:[%s756_s1 + $0x20] sm:$0xff]  ;;  %272 = vmatpush.bf16.msra.mxu2 %v545_v10  ;;  %v544_v13 = vld [vmem:[%s758_s3 + $0x28] sm:$0xff]  ;;  %vm164_vm1 = vcmask 1031168   ;;  %vm289_vm2 = vcmask 814080  }
   0xc   :  { %v535_v12 = vld [vmem:[%s756_s1 + $0x60] sm:$0xff]  ;;  %v526_v14 = vld [vmem:[%s756_s1 + $0x18] sm:$0xff]  ;;  %v525_v16 = vld [vmem:[%s756_s1 + $0x10] sm:$0xff]  ;;  %s381_s10 = sshll.u32 %s762_s7, 4  ;;  %vm372_vm3 = vcmask 15360   ;;  %s382_s10 = int_to_ptr.hbm [resolvable:$true] %s381_s10 }
   0xd   :  { %v534_v15 = vld [vmem:[%s756_s1 + $0x58] sm:$0xff]  ;;  %v533_v17 = vld [vmem:[%s756_s1 + $0x50] sm:$0xff]  ;;  %v524_v18 = vld [vmem:[%s756_s1 + $0x8] sm:$0xff] }
   0xe   :  { %187 = vmatpush.bf16.msra.mxu1 %v536_v9  ;;  %v532_v19 = vld [vmem:[%s756_s1 + $0x48] sm:$0xff]  ;;  %v523_v20 = vld [vmem:[%s756_s1] sm:$0xff]  ;;  %v542_v27 = vld [vmem:[%s758_s3 + $0x18] sm:$0xff] }
   0xf   :  { %175 = vmatpush.bf16.msra.mxu0 %v527_v11  ;;  %273 = vmatpush.bf16.msra.mxu2 %v544_v13  ;;  %v29_v21 = vld [vmem:[%s755_s0] sm:$0xff]  ;;  %v30_v23 = vld [vmem:[%s755_s0 + $0x8] sm:$0xff]  ;;  %v541_v28 = vld [vmem:[%s758_s3 + $0x10] sm:$0xff] }
  0x10   :  { %v531_v22 = vld [vmem:[%s756_s1 + $0x40] sm:$0xff]  ;;  %v31_v24 = vpack.c.bf16 %v29_v21, %v29_v21  ;;  %v32_v25 = vpack.c.bf16 %v30_v23, %v30_v23  ;;  %v540_v29 = vld [vmem:[%s758_s3 + $0x8] sm:$0xff]  ;;  %v554_v31 = vld [vmem:[%s760_s5 + $0x38] sm:$0xff]  ;;  %s589_s1 = smov [#allocation2]  }
  0x11   :  { %v543_v26 = vld [vmem:[%s758_s3 + $0x20] sm:$0xff]  ;;  %359 = vmatpush.bf16.msra.mxu3 %v554_v31  ;;  %v553_v32 = vld [vmem:[%s760_s5 + $0x30] sm:$0xff]  ;;  %v552_v33 = vld [vmem:[%s760_s5 + $0x28] sm:$0xff]  ;;  %s379_s9 = sshll.u32 %s589_s1, 4  ;;  %s380_s9 = int_to_ptr.vmem [resolvable:$true] %s379_s9 }
  0x12   :  { %188 = vmatpush.bf16.msra.mxu1 %v535_v12  ;;  %v539_v30 = vld [vmem:[%s758_s3] sm:$0xff]  ;;  %v550_v47 = vld [vmem:[%s760_s5 + $0x18] sm:$0xff]  ;;  %v549_v48 = vld [vmem:[%s760_s5 + $0x10] sm:$0xff] }
  0x13   :  { %176 = vmatpush.bf16.msra.mxu0 %v526_v14  ;;  %274 = vmatpush.bf16.msra.mxu2 %v543_v26  ;;  %v556_v34 = vld [vmem:[%s757_s2] ss:$0 sm:$0xff]  ;;  %v548_v49 = vld [vmem:[%s760_s5 + $0x8] sm:$0xff] }
  0x14   :  { %v551_v35 = vld [vmem:[%s760_s5 + $0x20] sm:$0xff] }
  0x15   :  { %360 = vmatpush.bf16.msra.mxu3 %v553_v32  ;;  %v547_v50 = vld [vmem:[%s760_s5] sm:$0xff] }
  0x16   :  { %189 = vmatpush.bf16.msra.mxu1 %v534_v15  ;;  %v557_v51 = vld [vmem:[%s759_s4] ss:$0 sm:$0xff] }
  0x17   :  { %177 = vmatpush.bf16.msra.mxu0 %v525_v16  ;;  %275 = vmatpush.bf16.msra.mxu2 %v542_v27  ;;  %v558_v60 = vld [vmem:[%s761_s6] ss:$0 sm:$0xff] }
  0x19   :  { %361 = vmatpush.bf16.msra.mxu3 %v552_v33 }
  0x1a   :  { %190 = vmatpush.bf16.msra.mxu1 %v533_v17 }
  0x1b   :  { %178 = vmatpush.bf16.msra.mxu0 %v524_v18  ;;  %276 = vmatpush.bf16.msra.mxu2 %v541_v28 }
  0x1d   :  { %362 = vmatpush.bf16.msra.mxu3 %v551_v35 }
  0x1e   :  { %191 = vmatpush.bf16.msra.mxu1 %v532_v19 }
  0x1f   :  { %179 = vmatpush.bf16.msra.mxu0 %v523_v20  ;;  %277 = vmatpush.bf16.msra.mxu2 %v540_v29 }
  0x21   :  { %363 = vmatpush.bf16.msra.mxu3 %v550_v47 }
  0x22   :  { %192 = vmatpush.bf16.msra.mxu1 %v531_v22  ;;  %180 = vmatmul.bf16.vlgmr.msra.gmra.mxu0 %v31_v24 }
  0x23   :  { %278 = vmatpush.bf16.msra.mxu2 %v539_v30 }
  0x25   :  { %458 = vmatmul.msk.bf16.vlgmr.msra.gmra.mxu1 %vm164_vm1, %v32_v25  ;;  %364 = vmatpush.bf16.msra.mxu3 %v549_v48 }
  0x29   :  { %365 = vmatpush.bf16.msra.mxu3 %v548_v49 }
  0x2d   :  { %366 = vmatpush.bf16.msra.mxu3 %v547_v50 }
  0x9f   :  { %v181_v36 = vpop.f32.mrf.mxu0 }
  0xa0   :  { %v182_v37 = vadd.f32 %v556_v34, %v181_v36 }
  0xa2   :  { %v194_v38 = vpop.f32.mrf.mxu1 }
  0xa3   :  { %v195_v39 = vadd.f32 %v194_v38, %v182_v37 }
  0xa5   :  { %v198_v40 = vmul.f32 0.5, %v195_v39 }
  0xa7   :  { %559 = vtanh.f32 %v198_v40  ;;  %v183_v41 = vpop.f32.mrf.mxu0 }
  0xaa   :  { %v196_v42 = vpop.f32.mrf.mxu1 }
  0xad   :  { %v560_v43 = vpop.eup %559 }
  0xae   :  { %v200_v44 = vmul.f32 0.5, %v560_v43 }
  0xb0   :  { %v201_v45 = vadd.f32 0.5, %v200_v44 }
  0xb2   :  { %v202_v46 = vpack.c.bf16 %v201_v45, %v201_v45 }
  0xb4   :  { %279 = vmatmul.bf16.vlgmr.msra.gmra.mxu2 %v202_v46 }
 0x137   :  { %v280_v52 = vpop.f32.mrf.mxu2 }
 0x138   :  { %v281_v53 = vadd.f32 %v557_v51, %v280_v52 }
 0x13a   :  { %v284_v54 = vmul.f32 0.5, %v281_v53 }
 0x13c   :  { %561 = vtanh.f32 %v284_v54 }
 0x13f   :  { %v282_v55 = vpop.f32.mrf.mxu2 }
 0x142   :  { %v562_v56 = vpop.eup %561 }
 0x143   :  { %v286_v57 = vmul.f32 0.5, %v562_v56 }
 0x145   :  { %v287_v58 = vadd.f32 0.5, %v286_v57 }
 0x147   :  { %v288_v59 = vpack.c.bf16 %v287_v58, %v287_v58 }
 0x149   :  { %367 = vmatmul.bf16.vlgmr.msra.gmra.mxu3 %v288_v59  ;;  %290 = vst.msk [vmem:[#allocation2] sm:$0xf] %vm289_vm2, %v288_v59 }
 0x14a   :  { %384 = dma.vmem_to_hbm [thread:$0]  %s380_s9, 64, %s382_s10, [#allocation3]  }
 0x1cc   :  { %v368_v61 = vpop.f32.mrf.mxu3 }
 0x1cd   :  { %v369_v62 = vadd.f32 %v558_v60, %v368_v61 }
 0x1cf   :  { %373 = vst.msk [vmem:[%s763_s8] sm:$0xff] %vm372_vm3, %v369_v62 }
 0x1d4   :  { %v370_v63 = vpop.f32.mrf.mxu3 }
 0x1d5   :  { %587 = dma.done.wait [#allocation3], 64  }
 0x1d6   :  { %588 = vsyncadd [#allocation3], 4294967232 }
 0x1d7   :  { %393 = vsyncpa [#allocation3], 1 }

</bundles_post_ra>
